<compile_context>
chip_gen: v6e
topology: v6e:2x2x1
jax: 0.10.0
libtpu: 0.0.40
codegen_flags: <defaults>
</compile_context>

<pallas_src>
import functools

import jax
import jax.numpy as jnp
from jax.experimental import pallas as pl
from jax.experimental.pallas import tpu as pltpu


_SUBLANE = 8


def _round_up(n: int, m: int) -> int:
    return ((n + m - 1) // m) * m


def _vmem_budget_and_limit():
    """Per-generation VMEM budget (for tile sizing) and scoped limit to request."""
    try:
        cap = int(getattr(pltpu.get_tpu_info(), "vmem_capacity_bytes"))
    except Exception:  # unknown chip / interpret mode
        cap = 64 * 1024 * 1024
    # Budget ~60% of physical for our own buffers, let the compiler use ~75%.
    return int(cap * 0.60), int(cap * 0.75)


def _make_mlp_kernel(num_layers: int):
    """Fused (Linear + sigmoid)^num_layers over one (tile_b, init_size) batch tile."""

    def kernel(*refs):
        x_ref = refs[0]
        param_refs = refs[1 : 1 + 2 * num_layers]
        o_ref = refs[1 + 2 * num_layers]

        h = x_ref[...]
        for i in range(num_layers):
            w = param_refs[2 * i][...]                             # (in_i, out_i)
            b = param_refs[2 * i + 1][...].astype(jnp.float32)     # (1, out_i)
            # MXU matmul with f32 accumulation; bias-add + sigmoid in f32
            # (v5e VPU/EUP have no bf16).
            h = jnp.dot(h.astype(w.dtype), w,
                        preferred_element_type=jnp.float32) + b
            h = jax.nn.sigmoid(h)
        o_ref[...] = h.astype(o_ref.dtype)

    return kernel


@functools.partial(jax.jit,
                   static_argnames=("fairness", "tile_b", "compute_dtype"))
def adversary_forward(x, y, params, fairness: str = "dp", tile_b=None,
                      compute_dtype=None):
    """Forward pass of Adversary (dp fairness path).

    x      : (B, init_size) float32
    y      : (B,) float32 (only used by the eq_opp path; unsupported here)
    params : flat tuple (W0, b0, W1, b1, ...) with W: (in, out), b: (1, out) or (out,)
    compute_dtype : optional dtype for matmul operands (e.g. jnp.bfloat16)
    """
    del y  # only needed for eq_opp (dynamic-shape masked_select, not supported)
    if fairness != "dp":
        raise NotImplementedError("Only the 'dp' fairness path is implemented.")

    num_layers = len(params) // 2
    batch, init_size = x.shape
    layer_in = [params[2 * i].shape[0] for i in range(num_layers)]
    layer_out = [params[2 * i].shape[1] for i in range(num_layers)]
    s_size = layer_out[-1]

    out_dtype = x.dtype
    if compute_dtype is not None:
        x = x.astype(compute_dtype)

    kparams = []
    for i in range(num_layers):
        w = params[2 * i]
        b = params[2 * i + 1].reshape(1, -1).astype(jnp.float32)
        if compute_dtype is not None:
            w = w.astype(compute_dtype)
        kparams += [w, b]

    params_bytes = sum(int(p.size) * p.dtype.itemsize for p in kparams)
    x_itemsize = x.dtype.itemsize
    out_itemsize = jnp.dtype(out_dtype).itemsize

    vmem_budget, vmem_limit = _vmem_budget_and_limit()

    # ---- choose a batch tile under the per-generation VMEM budget ------------
    if tile_b is None:
        tile_b = 4096  # big tiles: per-grid-step overhead (~0.35us) amortized
    tile_b = min(int(tile_b), _round_up(batch, _SUBLANE))
    tile_b = max(_SUBLANE, _round_up(tile_b, _SUBLANE))

    def _tile_bytes(tb):
        x_io = 2 * x_itemsize * tb * init_size          # double-buffered input tile
        o_io = 2 * out_itemsize * tb * s_size           # double-buffered output tile
        act = 4 * tb * (init_size + sum(layer_out))     # f32 intermediates / spill
        return x_io + o_io + act + params_bytes         # params resident (charged 1x)

    while tile_b > _SUBLANE and _tile_bytes(tile_b) > vmem_budget:
        tile_b = max(_SUBLANE, _round_up(tile_b // 2, _SUBLANE))

    # Ensure >= 2 grid steps when the batch allows it, so the "parallel" batch
    # axis gives both v7x TensorCores work.
    if batch >= 2 * _SUBLANE and pl.cdiv(batch, tile_b) < 2:
        tile_b = _round_up(pl.cdiv(batch, 2), _SUBLANE)

    batch_pad = _round_up(batch, tile_b)
    grid_b = batch_pad // tile_b

    x_p = x if batch_pad == batch else jnp.pad(x, ((0, batch_pad - batch), (0, 0)))

    # ---- BlockSpecs: x/out tiled over batch, params resident (constant index) -
    # Block dims equal to the full array dims are legal even when not multiples
    # of (8, 128), so no feature-dim padding is needed.
    in_specs = [pl.BlockSpec((tile_b, init_size), lambda gi: (gi, 0))]
    for i in range(num_layers):
        in_specs.append(pl.BlockSpec((layer_in[i], layer_out[i]), lambda gi: (0, 0)))
        in_specs.append(pl.BlockSpec((1, layer_out[i]), lambda gi: (0, 0)))
    out_specs = pl.BlockSpec((tile_b, s_size), lambda gi: (gi, 0))

    flops = 2 * batch_pad * sum(i_ * o_ for i_, o_ in zip(layer_in, layer_out))
    transcendentals = batch_pad * sum(layer_out)
    bytes_accessed = (batch_pad * init_size * x_itemsize
                      + params_bytes
                      + batch_pad * s_size * out_itemsize)

    out = pl.pallas_call(
        _make_mlp_kernel(num_layers),
        out_shape=jax.ShapeDtypeStruct((batch_pad, s_size), out_dtype),
        grid=(grid_b,),
        in_specs=in_specs,
        out_specs=out_specs,
        compiler_params=pltpu.CompilerParams(
            dimension_semantics=("parallel",),      # batch axis -> both TCs on v7x
            vmem_limit_bytes=int(vmem_limit)),
        cost_estimate=pl.CostEstimate(
            flops=flops,
            transcendentals=transcendentals,
            bytes_accessed=bytes_accessed),
    )(x_p, *kparams)

    return out if batch_pad == batch else out[:batch]


def init_adversary_params(key, init_size, adv_size, s_size):
    """Deterministic init matching the nn.Linear layer shapes of Adversary."""
    sizes = [init_size] + list(adv_size) + [s_size]
    params = []
    for i in range(len(sizes) - 1):
        fan_in, fan_out = sizes[i], sizes[i + 1]
        key, kw, kb = jax.random.split(key, 3)
        bound = 1.0 / jnp.sqrt(jnp.float32(fan_in))
        w = jax.random.uniform(kw, (fan_in, fan_out), jnp.float32, -bound, bound)
        b = jax.random.uniform(kb, (1, fan_out), jnp.float32, -bound, bound)
        params += [w, b]
    return tuple(params)


def _ref_mlp(x, params):
    h = x
    for i in range(len(params) // 2):
        h = jax.nn.sigmoid(h @ params[2 * i] + params[2 * i + 1].reshape(1, -1))
    return h


if __name__ == "__main__":
    key = jax.random.PRNGKey(0)
    k_x, k_y, k_p, k_x2, k_y2 = jax.random.split(key, 5)

    init_size = 32
    adv_size = (16,)   # one hidden adversary layer
    s_size = 1
    params = init_adversary_params(k_p, init_size, adv_size, s_size)

    # --- test 1: tiny shape (single grid step, narrow unpadded dims) ----------
    batch = 8
    x = jax.random.normal(k_x, (batch, init_size), jnp.float32)
    y = (jax.random.uniform(k_y, (batch,)) > 0.5).astype(jnp.float32)
    out = adversary_forward(x, y, params, fairness="dp")
    jax.block_until_ready(out)
    ref = _ref_mlp(x, params)
    assert out.shape == (batch, s_size)
    assert jnp.allclose(out, ref, atol=1e-5), "mismatch vs. reference (test 1)"

    # --- test 2: multi-tile batch grid (exercise batch padding + parallel axis)
    batch2 = 300
    x2 = jax.random.normal(k_x2, (batch2, init_size), jnp.float32)
    y2 = (jax.random.uniform(k_y2, (batch2,)) > 0.5).astype(jnp.float32)
    out2 = adversary_forward(x2, y2, params, fairness="dp", tile_b=128)
    jax.block_until_ready(out2)
    ref2 = _ref_mlp(x2, params)
    assert out2.shape == (batch2, s_size)
    assert jnp.allclose(out2, ref2, atol=1e-5), "mismatch vs. reference (test 2)"

    # --- test 3: bf16 matmul operands (mem-traffic optimization), f32 accum ----
    out3 = adversary_forward(x2, y2, params, fairness="dp",
                             compute_dtype=jnp.bfloat16)
    jax.block_until_ready(out3)
    assert out3.shape == (batch2, s_size)
    assert jnp.allclose(out3, ref2, atol=5e-2), "mismatch vs. reference (test 3)"

    print("KERNEL_OK")
</pallas_src>

<mosaic_0001>
module attributes {stable_mosaic.version = 11 : i64} {
  func.func @kernel(%arg0: i32, %arg1: memref<8x32xf32, #tpu.memory_space<vmem>>, %arg2: memref<32x16xf32, #tpu.memory_space<vmem>>, %arg3: memref<1x16xf32, #tpu.memory_space<vmem>>, %arg4: memref<16x1xf32, #tpu.memory_space<vmem>>, %arg5: memref<1x1xf32, #tpu.memory_space<vmem>>, %arg6: memref<8x1xf32, #tpu.memory_space<vmem>>) attributes {dimension_semantics = [#tpu.dimension_semantics<parallel>], iteration_bounds = array<i64: 1>, scalar_prefetch = 0 : i64, scratch_operands = 0 : i64, tpu.core_type = #tpu.core_type<tc>, window_params = [{transform_indices = @transform_0, window_bounds = array<i64: 8, 32>}, {pipeline_mode = #tpu.pipeline_mode<synchronous>, transform_indices = @transform_1, window_bounds = array<i64: 32, 16>}, {pipeline_mode = #tpu.pipeline_mode<synchronous>, transform_indices = @transform_2, window_bounds = array<i64: 1, 16>}, {pipeline_mode = #tpu.pipeline_mode<synchronous>, transform_indices = @transform_3, window_bounds = array<i64: 16, 1>}, {pipeline_mode = #tpu.pipeline_mode<synchronous>, transform_indices = @transform_4, window_bounds = array<i64: 1, 1>}, {transform_indices = @transform_5, window_bounds = array<i64: 8, 1>}]} {
    %c0 = arith.constant 0 : index
    %c0_0 = arith.constant 0 : index
    %0 = vector.load %arg1[%c0, %c0_0] : memref<8x32xf32, #tpu.memory_space<vmem>>, vector<8x32xf32>
    %c0_1 = arith.constant 0 : index
    %c0_2 = arith.constant 0 : index
    %1 = vector.load %arg2[%c0_1, %c0_2] : memref<32x16xf32, #tpu.memory_space<vmem>>, vector<32x16xf32>
    %c0_3 = arith.constant 0 : index
    %c0_4 = arith.constant 0 : index
    %2 = vector.load %arg3[%c0_3, %c0_4] : memref<1x16xf32, #tpu.memory_space<vmem>>, vector<1x16xf32>
    %cst = arith.constant dense<0.000000e+00> : vector<8x16xf32>
    %3 = tpu.matmul %0, %1, %cst {dimension_numbers = #tpu.dot_dimension_numbers<[1], [0], [0], [1], [0, 0, 1, 1], [], []>} : vector<8x32xf32>, vector<32x16xf32>, vector<8x16xf32> -> vector<8x16xf32>
    %4 = vector.broadcast %2 : vector<1x16xf32> to vector<8x16xf32>
    %5 = arith.addf %3, %4 : vector<8x16xf32>
    %6 = arith.negf %5 : vector<8x16xf32>
    %7 = math.exp %6 : vector<8x16xf32>
    %cst_5 = arith.constant 1.000000e+00 : f32
    %8 = vector.broadcast %cst_5 : f32 to vector<8x16xf32>
    %9 = arith.addf %8, %7 : vector<8x16xf32>
    %10 = arith.divf %8, %9 : vector<8x16xf32>
    %c0_6 = arith.constant 0 : index
    %c0_7 = arith.constant 0 : index
    %11 = vector.load %arg4[%c0_6, %c0_7] : memref<16x1xf32, #tpu.memory_space<vmem>>, vector<16x1xf32>
    %c0_8 = arith.constant 0 : index
    %c0_9 = arith.constant 0 : index
    %12 = vector.load %arg5[%c0_8, %c0_9] : memref<1x1xf32, #tpu.memory_space<vmem>>, vector<1x1xf32>
    %cst_10 = arith.constant dense<0.000000e+00> : vector<8x1xf32>
    %13 = tpu.matmul %10, %11, %cst_10 {dimension_numbers = #tpu.dot_dimension_numbers<[1], [0], [0], [1], [0, 0, 1, 1], [], []>} : vector<8x16xf32>, vector<16x1xf32>, vector<8x1xf32> -> vector<8x1xf32>
    %14 = vector.broadcast %12 : vector<1x1xf32> to vector<8x1xf32>
    %15 = arith.addf %13, %14 : vector<8x1xf32>
    %16 = arith.negf %15 : vector<8x1xf32>
    %17 = math.exp %16 : vector<8x1xf32>
    %cst_11 = arith.constant 1.000000e+00 : f32
    %18 = vector.broadcast %cst_11 : f32 to vector<8x1xf32>
    %19 = arith.addf %18, %17 : vector<8x1xf32>
    %20 = arith.divf %18, %19 : vector<8x1xf32>
    %c0_12 = arith.constant 0 : index
    %c0_13 = arith.constant 0 : index
    %21 = vector.load %arg6[%c0_12, %c0_13] : memref<8x1xf32, #tpu.memory_space<vmem>>, vector<8x1xf32>
    tpu.vector_store %arg6[%c0_12, %c0_13], %20 {strides = array<i32>} : memref<8x1xf32, #tpu.memory_space<vmem>>, vector<8x1xf32>,
    return
  }
  func.func @transform_0(%arg0: i32) -> (i32, i32) {
    %c0_i32 = arith.constant 0 : i32
    %c0_i32_0 = arith.constant 0 : i32
    return %arg0, %c0_i32 : i32, i32
  }
  func.func @transform_1(%arg0: i32) -> (i32, i32) {
    %c0_i32 = arith.constant 0 : i32
    %c0_i32_0 = arith.constant 0 : i32
    %c0_i32_1 = arith.constant 0 : i32
    return %c0_i32, %c0_i32_0 : i32, i32
  }
  func.func @transform_2(%arg0: i32) -> (i32, i32) {
    %c0_i32 = arith.constant 0 : i32
    %c0_i32_0 = arith.constant 0 : i32
    %c0_i32_1 = arith.constant 0 : i32
    return %c0_i32, %c0_i32_0 : i32, i32
  }
  func.func @transform_3(%arg0: i32) -> (i32, i32) {
    %c0_i32 = arith.constant 0 : i32
    %c0_i32_0 = arith.constant 0 : i32
    %c0_i32_1 = arith.constant 0 : i32
    return %c0_i32, %c0_i32_0 : i32, i32
  }
  func.func @transform_4(%arg0: i32) -> (i32, i32) {
    %c0_i32 = arith.constant 0 : i32
    %c0_i32_0 = arith.constant 0 : i32
    %c0_i32_1 = arith.constant 0 : i32
    return %c0_i32, %c0_i32_0 : i32, i32
  }
  func.func @transform_5(%arg0: i32) -> (i32, i32) {
    %c0_i32 = arith.constant 0 : i32
    %c0_i32_0 = arith.constant 0 : i32
    return %arg0, %c0_i32 : i32, i32
  }
}

</mosaic_0001>

<bundles_post_ra>
// kernel: adversary_forward.1
= control target key start
LH: loop header
LB: loop body
LE: loop exit
PB: predicated region body
PF: predicated region fallthrough
CT: control target
= control target key end

     0   :  { %v251_v0 = vmov 0.0   ;;  %vm252_vm0 = vmmov 0   ;;  %vm34_vm1 = vcmask 261120   ;;  %vm123_vm2 = vcmask 130048   ;;  %s313_s1 = inlined_call_operand.vmem [shape: f32[32,16], index: 1, kind: input, shape index: {}]   ;;  %s314_s0 = inlined_call_operand.vmem [shape: f32[8,32], index: 0, kind: input, shape index: {}]   ;;  %s315_s3 = inlined_call_operand.vmem [shape: f32[16,1], index: 3, kind: input, shape index: {}]   ;;  %s316_s4 = inlined_call_operand.<no memory space> [shape: f32[1,1], index: 4, kind: input, shape index: {}]   ;;  %s317_s2 = inlined_call_operand.vmem [shape: f32[1,16], index: 2, kind: input, shape index: {}]   ;;  %s318_s5 = inlined_call_operand.vmem [shape: f32[8,1], index: 5, kind: output, shape index: {}]  }
   0x1   :  { %223 = vmatprep.subr.mxu0 %v251_v0  ;;  %v26_v1 = vld [vmem:[%s313_s1 + $0x18] sm:$0xff]  ;;  %v25_v2 = vld [vmem:[%s313_s1 + $0x10] sm:$0xff]  ;;  %231 = vmatprep.mubr.msk.f32.mxu0 %vm252_vm0, %v251_v0  ;;  %v24_v3 = vld [vmem:[%s313_s1 + $0x8] sm:$0xff]  ;;  %v10_v8 = vstv %s316_s4  ;;  %vm203_vm3 = vcmask 7168  }
   0x2   :  { %224 = vmatpush3.msra.mxu0 %v26_v1  ;;  %234 = vmatprep.subr.mxu1 %v251_v0  ;;  %v23_v4 = vld [vmem:[%s313_s1] sm:$0xff]  ;;  %v115_v6 = vld [vmem:[%s315_s3 + $0x8] sm:$0xff]  ;;  %11 = vst [vmem:[#allocation2] sm:$0x1] %v10_v8 }
   0x3   :  { %225 = vmatprep.subr.mxu0 %v251_v0  ;;  %238 = vmatprep.mubr.msk.f32.mxu1 %vm252_vm0, %v251_v0  ;;  %v22_v5 = vld [vmem:[%s314_s0] sm:$0xff] }
   0x4   :  { %226 = vmatpush3.msra.mxu0 %v25_v2  ;;  %v114_v7 = vld [vmem:[%s315_s3] sm:$0xff]  ;;  %235 = vmatpush3.msra.mxu1 %v115_v6 }
   0x5   :  { %227 = vmatprep.subr.mxu0 %v251_v0  ;;  %236 = vmatprep.subr.mxu1 %v251_v0  ;;  %v209_v9 = vld [vmem:[%s317_s2] ss:$0 sm:$0xff] }
   0x6   :  { %228 = vmatpush3.msra.mxu0 %v24_v3  ;;  %237 = vmatpush3.msra.mxu1 %v114_v7 }
   0x7   :  { %229 = vmatprep.subr.mxu0 %v251_v0 }
   0x8   :  { %230 = vmatpush3.msra.mxu0 %v23_v4 }
   0x9   :  { %232 = vmatmul.mubr.msk.f32.vlgmr.msra.gmra.mxu0 %vm34_vm1, %v22_v5  ;;  %v212_v17 = vld [vmem:[#allocation2] ss:$0 sm:$0xff] }
  0xc9   :  { %v104_v10 = vpop.f32.mrf.mxu0 }
  0xca   :  { %v105_v11 = vadd.f32 %v209_v9, %v104_v10 }
  0xcb   :  { %v233_v12 = vpop.f32.mrf.mxu0 }
  0xcc   :  { %v211_v13 = vmul.f32 -1.442695, %v105_v11 }
  0xce   :  { %243 = vpow2.f32 %v211_v13 }
  0xdb   :  { %v244_v14 = vpop.eup %243 }
  0xdc   :  { %v111_v15 = vadd.f32 1.0, %v244_v14 }
  0xde   :  { %245 = vrcp.f32 %v111_v15 }
  0xeb   :  { %v246_v16 = vpop.eup %245 }
  0xec   :  { %239 = vmatmul.mubr.msk.f32.vlgmr.msra.gmra.mxu1 %vm123_vm2, %v246_v16 }
 0x1ac   :  { %v193_v18 = vpop.f32.mrf.mxu1 }
 0x1ad   :  { %v194_v19 = vadd.f32 %v212_v17, %v193_v18 }
 0x1ae   :  { %v240_v20 = vpop.f32.mrf.mxu1 }
 0x1af   :  { %v214_v21 = vmul.f32 -1.442695, %v194_v19 }
 0x1b1   :  { %247 = vpow2.f32 %v214_v21 }
 0x1be   :  { %v248_v22 = vpop.eup %247 }
 0x1bf   :  { %v200_v23 = vadd.f32 1.0, %v248_v22 }
 0x1c1   :  { %249 = vrcp.f32 %v200_v23 }
 0x1ce   :  { %v250_v24 = vpop.eup %249 }
 0x1cf   :  { %204 = vst.msk [vmem:[%s318_s5] sm:$0xff] %vm203_vm3, %v250_v24 }

</bundles_post_ra>
